<compile_context>
chip_gen: v5e
topology: v5e:2x2
jax: 0.10.0
libtpu: 0.0.40
codegen_flags: <defaults>
</compile_context>

<pallas_src>
import math

import jax
import jax.numpy as jnp
from jax import lax
from jax.experimental import pallas as pl
from jax.experimental.pallas import tpu as pltpu


def _round_up(x, m):
    return (x + m - 1) // m * m


def _round_down(x, m):
    return (x // m) * m


# ---------------------------------------------------------------------------
# Kernels
# ---------------------------------------------------------------------------

def _logreg_packed_kernel(xp_ref, wp_ref, bp_ref, o_ref):
    # xp_ref : [TR, P*ft_in]     lane-dense x tile, streamed per grid step
    # wp_ref : [P*ft_in, P*nb]   resident block-diagonal weight (P copies of W^T)
    # bp_ref : [1, P*nb]         resident tiled bias
    # o_ref  : [TR, P*nb]        lane-dense output (full-width stores)
    acc = jnp.dot(xp_ref[...], wp_ref[...], preferred_element_type=jnp.float32)
    o_ref[...] = (acc + bp_ref[...]).astype(o_ref.dtype)


def _logreg_kernel(x_ref, w_ref, b_ref, o_ref):
    # Generic (unpacked) path: x @ W^T + b with torch-layout W.
    # x_ref : [TN, ft_in]   streamed;  w_ref : [nb, ft_in];  b_ref : [1, nb]
    acc = lax.dot_general(
        x_ref[...], w_ref[...],
        dimension_numbers=(((1,), (1,)), ((), ())),
        preferred_element_type=jnp.float32)
    o_ref[...] = (acc + b_ref[...]).astype(o_ref.dtype)


# ---------------------------------------------------------------------------
# Wrapper
# ---------------------------------------------------------------------------

def _pick_pack(n, ft_in, nb_classes, max_pack=8):
    """Rows fused per packed super-row (lane-dense loads/stores + fatter MXU pushes)."""
    if ft_in >= 128 and nb_classes >= 128:
        return 1                       # already lane-dense, nothing to gain
    p = max_pack
    while p > 1:
        if n >= p and n % p == 0 and p * ft_in <= 512 and p * nb_classes <= 512:
            return p
        p //= 2
    return 1


def logreg_forward(x, weight, bias, *, tile_n=16384):
    """Equivalent of torch LogReg.forward: x @ weight.T + bias.

    x:      [N, ft_in]           float32
    weight: [nb_classes, ft_in]  float32 (torch nn.Linear layout)
    bias:   [nb_classes]         float32
    returns [N, nb_classes]      float32
    """
    n, ft_in = x.shape
    nb_classes = weight.shape[0]
    out_dtype = x.dtype

    pack = _pick_pack(n, ft_in, nb_classes)

    if pack > 1:
        # ------------------ lane-dense packed fast path -------------------
        p = pack
        n_rows = n // p
        kp = p * ft_in          # packed contraction dim (256 for ft_in=32, P=8)
        np_out = p * nb_classes  # packed output width   (128 for nb=16,   P=8)

        # Free row-major reshape: packed row r = x rows [p*r, p*r+p).
        xp = x.reshape(n_rows, kp)

        # Block-diagonal weight: block (q, q) = W^T, zeros elsewhere.
        wt = weight.T.astype(out_dtype)                       # [ft_in, nb]
        w_packed = jnp.einsum('pq,fc->pfqc', jnp.eye(p, dtype=out_dtype), wt
                              ).reshape(kp, np_out)           # [kp, np_out]
        b_packed = jnp.tile(bias.astype(out_dtype), p).reshape(1, np_out)

        # Packed-row tile.  Default tile_n=16384 rows -> 2048 packed rows:
        #   double-buffered x  = 2 * 2048*256*4 = 4 MiB
        #   double-buffered out= 2 * 2048*128*4 = 2 MiB
        #   resident W_packed  = 128 KiB
        # -> ~6 MiB, inside every generation's default scoped VMEM.
        tr = min(max(tile_n // p, 8), n_rows)
        row_bytes = 8 * (_round_up(kp, 128) + _round_up(np_out, 128))  # f32, 2 bufs
        tr = min(tr, max(8, _round_down((12 << 20) // row_bytes, 8)))
        if tr < n_rows:
            tr = max(8, _round_down(tr, 8))
        grid = (pl.cdiv(n_rows, tr),)   # partial last block masked by Pallas

        cost = pl.CostEstimate(
            flops=2 * n_rows * kp * np_out,
            transcendentals=0,
            bytes_accessed=4 * (n_rows * kp + kp * np_out + np_out
                                + n_rows * np_out))

        out = pl.pallas_call(
            _logreg_packed_kernel,
            out_shape=jax.ShapeDtypeStruct((n_rows, np_out), out_dtype),
            grid_spec=pltpu.PrefetchScalarGridSpec(
                num_scalar_prefetch=0,
                grid=grid,
                in_specs=[
                    pl.BlockSpec((tr, kp), lambda i: (i, 0)),       # streamed x
                    pl.BlockSpec((kp, np_out), lambda i: (0, 0)),   # resident W
                    pl.BlockSpec((1, np_out), lambda i: (0, 0)),    # resident b
                ],
                out_specs=pl.BlockSpec((tr, np_out), lambda i: (i, 0)),
            ),
            compiler_params=pltpu.CompilerParams(
                dimension_semantics=("parallel",)),
            cost_estimate=cost,
        )(xp, w_packed, b_packed)

        # Free row-major reshape back (same bytes as the [n, nb] answer).
        return out.reshape(n, nb_classes)

    # ------------------ generic path (N % pack != 0) ----------------------
    # NOTE: [tn, ft_in<128] / [tn, nb<128] f32 blocks are lane-padded to 128
    # in VMEM, so budget with padded widths (2 KiB per row double-buffered for
    # ft_in=32, nb=16).
    tn = min(tile_n, n)
    row_bytes = 8 * (_round_up(max(ft_in, 1), 128)
                     + _round_up(max(nb_classes, 1), 128))
    tn = min(tn, max(8, _round_down((12 << 20) // row_bytes, 8)))
    if tn < n:
        tn = max(8, _round_down(tn, 8))
    grid = (pl.cdiv(n, tn),)            # no jnp.pad; Pallas masks the last block

    b2 = bias.reshape(1, nb_classes).astype(out_dtype)

    cost = pl.CostEstimate(
        flops=2 * n * ft_in * nb_classes,
        transcendentals=0,
        bytes_accessed=4 * (n * ft_in + ft_in * nb_classes + nb_classes
                            + n * nb_classes))

    out = pl.pallas_call(
        _logreg_kernel,
        out_shape=jax.ShapeDtypeStruct((n, nb_classes), out_dtype),
        grid_spec=pltpu.PrefetchScalarGridSpec(
            num_scalar_prefetch=0,
            grid=grid,
            in_specs=[
                pl.BlockSpec((tn, ft_in), lambda i: (i, 0)),          # streamed x
                pl.BlockSpec((nb_classes, ft_in), lambda i: (0, 0)),  # resident W
                pl.BlockSpec((1, nb_classes), lambda i: (0, 0)),      # resident b
            ],
            out_specs=pl.BlockSpec((tn, nb_classes), lambda i: (i, 0)),
        ),
        compiler_params=pltpu.CompilerParams(
            dimension_semantics=("parallel",)),
        cost_estimate=cost,
    )(x, weight, b2)
    return out


def init_logreg_params(key, ft_in, nb_classes):
    """Deterministic xavier_uniform_ weight, zero bias (matches weights_init)."""
    limit = math.sqrt(6.0 / (ft_in + nb_classes))   # gain=1 xavier uniform
    weight = jax.random.uniform(
        key, (nb_classes, ft_in), dtype=jnp.float32, minval=-limit, maxval=limit)
    bias = jnp.zeros((nb_classes,), dtype=jnp.float32)
    return weight, bias


if __name__ == "__main__":
    ft_in = 32
    nb_classes = 16

    key = jax.random.PRNGKey(0)
    kx, kw = jax.random.split(key)
    weight, bias = init_logreg_params(kw, ft_in, nb_classes)

    # 1) Small batch, packed fast path (N % 8 == 0), single tile.
    x = jax.random.normal(kx, (8, ft_in), dtype=jnp.float32)
    out = jax.block_until_ready(logreg_forward(x, weight, bias))
    ref = x @ weight.T + bias
    assert out.shape == (8, nb_classes)
    assert jnp.allclose(out, ref, atol=1e-4, rtol=1e-4)

    # 2) Packed path, multi-tile grid with a partial (masked) last block.
    x2 = jax.random.normal(jax.random.PRNGKey(1), (1048, ft_in), dtype=jnp.float32)
    out2 = jax.block_until_ready(logreg_forward(x2, weight, bias, tile_n=64))
    ref2 = x2 @ weight.T + bias
    assert out2.shape == (1048, nb_classes)
    assert jnp.allclose(out2, ref2, atol=1e-4, rtol=1e-4)

    # 3) Generic path (N indivisible by pack), multi-tile + partial last block.
    x3 = jax.random.normal(jax.random.PRNGKey(2), (1051, ft_in), dtype=jnp.float32)
    out3 = jax.block_until_ready(logreg_forward(x3, weight, bias, tile_n=100))
    ref3 = x3 @ weight.T + bias
    assert out3.shape == (1051, nb_classes)
    assert jnp.allclose(out3, ref3, atol=1e-4, rtol=1e-4)

    print("KERNEL_OK")
</pallas_src>

<mosaic_0001>
module attributes {stable_mosaic.version = 11 : i64} {
  func.func @_logreg_packed_kernel(%arg0: i32, %arg1: memref<1x256xf32, #tpu.memory_space<vmem>>, %arg2: memref<256x128xf32, #tpu.memory_space<vmem>>, %arg3: memref<1x128xf32, #tpu.memory_space<vmem>>, %arg4: memref<1x128xf32, #tpu.memory_space<vmem>>) attributes {dimension_semantics = [#tpu.dimension_semantics<parallel>], iteration_bounds = array<i64: 1>, scalar_prefetch = 0 : i64, scratch_operands = 0 : i64, tpu.core_type = #tpu.core_type<tc>, window_params = [{transform_indices = @transform_0, window_bounds = array<i64: 1, 256>}, {pipeline_mode = #tpu.pipeline_mode<synchronous>, transform_indices = @transform_1, window_bounds = array<i64: 256, 128>}, {pipeline_mode = #tpu.pipeline_mode<synchronous>, transform_indices = @transform_2, window_bounds = array<i64: 1, 128>}, {transform_indices = @transform_3, window_bounds = array<i64: 1, 128>}]} {
    %c0 = arith.constant 0 : index
    %c0_0 = arith.constant 0 : index
    %0 = vector.load %arg1[%c0, %c0_0] : memref<1x256xf32, #tpu.memory_space<vmem>>, vector<1x256xf32>
    %c0_1 = arith.constant 0 : index
    %c0_2 = arith.constant 0 : index
    %1 = vector.load %arg2[%c0_1, %c0_2] : memref<256x128xf32, #tpu.memory_space<vmem>>, vector<256x128xf32>
    %cst = arith.constant dense<0.000000e+00> : vector<1x128xf32>
    %2 = tpu.matmul %0, %1, %cst {dimension_numbers = #tpu.dot_dimension_numbers<[1], [0], [0], [1], [0, 0, 1, 1], [], []>} : vector<1x256xf32>, vector<256x128xf32>, vector<1x128xf32> -> vector<1x128xf32>
    %c0_3 = arith.constant 0 : index
    %c0_4 = arith.constant 0 : index
    %3 = vector.load %arg3[%c0_3, %c0_4] : memref<1x128xf32, #tpu.memory_space<vmem>>, vector<1x128xf32>
    %4 = arith.addf %2, %3 : vector<1x128xf32>
    %c0_5 = arith.constant 0 : index
    %c0_6 = arith.constant 0 : index
    %5 = vector.load %arg4[%c0_5, %c0_6] : memref<1x128xf32, #tpu.memory_space<vmem>>, vector<1x128xf32>
    tpu.vector_store %arg4[%c0_5, %c0_6], %4 {strides = array<i32>} : memref<1x128xf32, #tpu.memory_space<vmem>>, vector<1x128xf32>,
    return
  }
  func.func @transform_0(%arg0: i32) -> (i32, i32) {
    %c0_i32 = arith.constant 0 : i32
    %c0_i32_0 = arith.constant 0 : i32
    return %arg0, %c0_i32 : i32, i32
  }
  func.func @transform_1(%arg0: i32) -> (i32, i32) {
    %c0_i32 = arith.constant 0 : i32
    %c0_i32_0 = arith.constant 0 : i32
    %c0_i32_1 = arith.constant 0 : i32
    return %c0_i32, %c0_i32_0 : i32, i32
  }
  func.func @transform_2(%arg0: i32) -> (i32, i32) {
    %c0_i32 = arith.constant 0 : i32
    %c0_i32_0 = arith.constant 0 : i32
    %c0_i32_1 = arith.constant 0 : i32
    return %c0_i32, %c0_i32_0 : i32, i32
  }
  func.func @transform_3(%arg0: i32) -> (i32, i32) {
    %c0_i32 = arith.constant 0 : i32
    %c0_i32_0 = arith.constant 0 : i32
    return %arg0, %c0_i32 : i32, i32
  }
}

</mosaic_0001>

<bundles_post_ra>
// kernel: tpu_custom_call.1
= control target key start
LH: loop header
LB: loop body
LE: loop exit
PB: predicated region body
PF: predicated region fallthrough
CT: control target
= control target key end

     0   :  { %8 = vsyncpa [#allocation3], 0  ;;  %s263_s0 = inlined_call_operand.hbm [shape: f32[1,256], index: 0, kind: input, shape index: {}]   ;;  %s264_s1 = inlined_call_operand.hbm [shape: f32[256,128], index: 1, kind: input, shape index: {}]   ;;  %s265_s2 = inlined_call_operand.vmem [shape: f32[1,128], index: 2, kind: input, shape index: {}]   ;;  %s266_s3 = inlined_call_operand.hbm [shape: f32[1,128], index: 3, kind: output, shape index: {}]  }
   0x1   :  { %9 = vsyncpa [#allocation6], 0 }
   0x2   :  { %10 = vsyncpa [#allocation4], 0  ;;  %s16_s14 = sshll.u32 %s263_s0, 4  ;;  %s226_s15 = smov [#allocation2]   ;;  %s17_s14 = int_to_ptr.hbm [resolvable:$true] %s16_s14 }
   0x3   :  { %s18_s16 = sshll.u32 %s226_s15, 4  ;;  %s26_s19 = sshll.u32 %s264_s1, 4  ;;  %s19_s16 = int_to_ptr.vmem [resolvable:$true] %s18_s16  ;;  %s27_s19 = int_to_ptr.hbm [resolvable:$true] %s26_s19 }
   0x4   :  { %21 = dma.hbm_to_vmem [thread:$0]  %s17_s14, 32, %s19_s16, [#allocation3]  }
   0x5   :  { %s227_s20 = smov [#allocation5]   ;;  %s228_s22 = smov 128  }
   0x6   :  { %s28_s21 = sshll.u32 %s227_s20, 4  ;;  %s229_s23 = smov 8   ;;  %s29_s21 = int_to_ptr.vmem [resolvable:$true] %s28_s21 }
   0x7   :  { %34 = dma.hbm_to_vmem [thread:$0]  %s27_s19, 4096, %s29_s21, [#allocation6], %s228_s22, %s228_s22, %s229_s23  }
   0x8   :  { %220 = dma.done.wait [#allocation3], 32  }
   0x9   :  { %221 = vsyncadd [#allocation3], 4294967264 }
   0xa   :  { %222 = dma.done.wait [#allocation6], 4096  }
   0xb   :  { %223 = vsyncadd [#allocation6], 4294963200  ;;  %v61_v0 = vld [vmem:[#allocation5 + $0x78] sm:$0xff]  ;;  %v60_v1 = vld [vmem:[#allocation5 + $0x70] sm:$0xff]  ;;  %s230_s24 = smov [#allocation7]   ;;  %s132_s28 = sshll.u32 %s266_s3, 4  ;;  %s133_s28 = int_to_ptr.hbm [resolvable:$true] %s132_s28 }
   0xc   :  { %v77_v2 = vld [vmem:[#allocation5 + $0xf8] sm:$0xff]  ;;  %84 = vmatpush.msra.mxu0 %v61_v0  ;;  %v76_v3 = vld [vmem:[#allocation5 + $0xf0] sm:$0xff]  ;;  %v59_v4 = vld [vmem:[#allocation5 + $0x68] sm:$0xff]  ;;  %s130_s25 = sshll.u32 %s230_s24, 4  ;;  %s131_s25 = int_to_ptr.vmem [resolvable:$true] %s130_s25 }
   0xd   :  { %104 = vmatpush.msra.mxu1 %v77_v2  ;;  %v75_v5 = vld [vmem:[#allocation5 + $0xe8] sm:$0xff]  ;;  %v58_v6 = vld [vmem:[#allocation5 + $0x60] sm:$0xff]  ;;  %v57_v8 = vld [vmem:[#allocation5 + $0x58] sm:$0xff] }
   0xe   :  { %85 = vmatpush.msra.mxu0 %v60_v1  ;;  %v74_v7 = vld [vmem:[#allocation5 + $0xe0] sm:$0xff]  ;;  %v73_v9 = vld [vmem:[#allocation5 + $0xd8] sm:$0xff]  ;;  %v56_v10 = vld [vmem:[#allocation5 + $0x50] sm:$0xff] }
   0xf   :  { %105 = vmatpush.msra.mxu1 %v76_v3  ;;  %v72_v11 = vld [vmem:[#allocation5 + $0xd0] sm:$0xff]  ;;  %v55_v12 = vld [vmem:[#allocation5 + $0x48] sm:$0xff]  ;;  %v54_v14 = vld [vmem:[#allocation5 + $0x40] sm:$0xff] }
  0x10   :  { %86 = vmatpush.msra.mxu0 %v59_v4  ;;  %v71_v13 = vld [vmem:[#allocation5 + $0xc8] sm:$0xff]  ;;  %v70_v15 = vld [vmem:[#allocation5 + $0xc0] sm:$0xff]  ;;  %v53_v16 = vld [vmem:[#allocation5 + $0x38] sm:$0xff] }
  0x11   :  { %106 = vmatpush.msra.mxu1 %v75_v5  ;;  %v69_v17 = vld [vmem:[#allocation5 + $0xb8] sm:$0xff]  ;;  %v52_v18 = vld [vmem:[#allocation5 + $0x30] sm:$0xff]  ;;  %v51_v20 = vld [vmem:[#allocation5 + $0x28] sm:$0xff] }
  0x12   :  { %87 = vmatpush.msra.mxu0 %v58_v6  ;;  %v68_v19 = vld [vmem:[#allocation5 + $0xb0] sm:$0xff]  ;;  %v67_v21 = vld [vmem:[#allocation5 + $0xa8] sm:$0xff]  ;;  %v50_v22 = vld [vmem:[#allocation5 + $0x20] sm:$0xff] }
  0x13   :  { %107 = vmatpush.msra.mxu1 %v74_v7  ;;  %v66_v23 = vld [vmem:[#allocation5 + $0xa0] sm:$0xff]  ;;  %v49_v24 = vld [vmem:[#allocation5 + $0x18] sm:$0xff]  ;;  %v48_v26 = vld [vmem:[#allocation5 + $0x10] sm:$0xff] }
  0x14   :  { %88 = vmatpush.msra.mxu0 %v57_v8  ;;  %v65_v25 = vld [vmem:[#allocation5 + $0x98] sm:$0xff]  ;;  %v64_v27 = vld [vmem:[#allocation5 + $0x90] sm:$0xff]  ;;  %v47_v29 = vld [vmem:[#allocation5 + $0x8] sm:$0xff] }
  0x15   :  { %108 = vmatpush.msra.mxu1 %v73_v9  ;;  %v45_v28 = vld [vmem:[#allocation2] sm:$0x3]  ;;  %v63_v30 = vld [vmem:[#allocation5 + $0x88] sm:$0xff]  ;;  %v46_v31 = vld [vmem:[#allocation5] sm:$0xff] }
  0x16   :  { %89 = vmatpush.msra.mxu0 %v56_v10  ;;  %v80_v32 = vperm.slane %v45_v28, 0  ;;  %v62_v33 = vld [vmem:[#allocation5 + $0x80] sm:$0xff]  ;;  %v81_v34 = vperm.slane %v45_v28, 1  ;;  %v78_v35 = vld [vmem:[%s265_s2] sm:$0x1] }
  0x17   :  { %109 = vmatpush.msra.mxu1 %v72_v11 }
  0x18   :  { %90 = vmatpush.msra.mxu0 %v55_v12 }
  0x19   :  { %110 = vmatpush.msra.mxu1 %v71_v13 }
  0x1a   :  { %91 = vmatpush.msra.mxu0 %v54_v14 }
  0x1b   :  { %111 = vmatpush.msra.mxu1 %v70_v15 }
  0x1c   :  { %92 = vmatpush.msra.mxu0 %v53_v16 }
  0x1d   :  { %112 = vmatpush.msra.mxu1 %v69_v17 }
  0x1e   :  { %93 = vmatpush.msra.mxu0 %v52_v18 }
  0x1f   :  { %113 = vmatpush.msra.mxu1 %v68_v19 }
  0x20   :  { %94 = vmatpush.msra.mxu0 %v51_v20 }
  0x21   :  { %114 = vmatpush.msra.mxu1 %v67_v21 }
  0x22   :  { %95 = vmatpush.msra.mxu0 %v50_v22 }
  0x23   :  { %115 = vmatpush.msra.mxu1 %v66_v23 }
  0x24   :  { %96 = vmatpush.msra.mxu0 %v49_v24 }
  0x25   :  { %116 = vmatpush.msra.mxu1 %v65_v25 }
  0x26   :  { %97 = vmatpush.msra.mxu0 %v48_v26 }
  0x27   :  { %117 = vmatpush.msra.mxu1 %v64_v27 }
  0x28   :  { %98 = vmatpush.msra.mxu0 %v47_v29 }
  0x29   :  { %118 = vmatpush.msra.mxu1 %v63_v30 }
  0x2a   :  { %99 = vmatpush.msra.mxu0 %v46_v31 }
  0x2b   :  { %119 = vmatpush.msra.mxu1 %v62_v33  ;;  %100 = vmatmul.f32.vlgmr.msra.gmra.mxu0 %v80_v32 }
  0x2c   :  { %120 = vmatmul.f32.vlgmr.msra.gmra.mxu1 %v81_v34 }
  0xa8   :  { %v101_v36 = vpop.f32.mrf.mxu0 }
  0xa9   :  { %v121_v37 = vpop.f32.mrf.mxu1  ;;  %v102_v38 = vadd.f32 %v101_v36, %v78_v35 }
  0xab   :  { %v122_v39 = vadd.f32 %v121_v37, %v102_v38 }
  0xad   :  { %124 = vst [vmem:[#allocation7] sm:$0x1] %v122_v39 }
  0xae   :  { %135 = dma.vmem_to_hbm [thread:$0]  %s131_s25, 16, %s133_s28, [#allocation4]  }
  0xaf   :  { %224 = dma.done.wait [#allocation4], 16  }
  0xb0   :  { %225 = vsyncadd [#allocation4], 4294967280 }
  0xb1   :  { %140 = vsyncpa [#allocation3], 1 }
  0xb2   :  { %141 = vsyncpa [#allocation6], 1 }
  0xb3   :  { %142 = vsyncpa [#allocation4], 1 }

</bundles_post_ra>
